<compile_context>
chip_gen: v5e
topology: v5e:2x2
jax: 0.10.0
libtpu: 0.0.40
codegen_flags: <defaults>
</compile_context>

<pallas_src>
import jax
import jax.numpy as jnp
from jax.experimental import pallas as pl
from jax.experimental.pallas import tpu as pltpu


def _linear_kernel(x_ref, w_ref, b_ref, o_ref):
    # x_ref: (S, 1, 1, H)  one batch's sequence slice (transpose done by the DMA)
    # w_ref: (E_pad, H)    PyTorch Linear weight layout, zero-padded on E
    # b_ref: (1, E_pad)    f32 bias, zero-padded on E
    # o_ref: (S, E_pad)    lane-dense output tile (E_pad % 128 == 0)
    x = x_ref[:, 0, 0, :]                                   # (S, H)
    # Contract on H of both operands: no weight transpose / XLU relayout.
    # NOTE: default matmul precision; set precision=jax.lax.Precision.HIGHEST
    # here if bit-faithful fp32 vs. PyTorch is required at large H.
    acc = jax.lax.dot_general(
        x, w_ref[...],
        dimension_numbers=(((1,), (1,)), ((), ())),
        preferred_element_type=jnp.float32,
    )                                                       # (S, E_pad) f32
    acc = acc + b_ref[...]                                  # bias already f32
    o_ref[...] = acc.astype(o_ref.dtype)


def swa_linear(hidden_states, weight, bias):
    """hidden_states: (S, B, H); weight: (E, H); bias: (E,).  Returns (B, S, E)."""
    S, B, H = hidden_states.shape
    E = weight.shape[0]

    # Pad E up to a lane multiple so output stores are unmasked / lane-dense.
    E_pad = ((E + 127) // 128) * 128
    if E_pad != E:
        weight = jnp.pad(weight, ((0, E_pad - E), (0, 0)))
        bias = jnp.pad(bias, (0, E_pad - E))
    b2d = bias.reshape(1, E_pad)

    # Free contiguous reshape: keeps (1, H) as the trailing dims so the
    # per-batch block below equals the array's trailing dims (legal tiling),
    # while B becomes a leading dim we can step over with the grid.
    x4 = hidden_states.reshape(S, B, 1, H)

    out_flat = pl.pallas_call(
        _linear_kernel,
        out_shape=jax.ShapeDtypeStruct((B * S, E_pad), hidden_states.dtype),
        grid=(B,),
        in_specs=[
            # Transpose folded into the index_map: grid step b fetches x[:, b].
            pl.BlockSpec((S, 1, 1, H), lambda b: (0, b, 0, 0)),
            # Weight / bias: single resident block (same index every step).
            pl.BlockSpec((E_pad, H), lambda b: (0, 0)),
            pl.BlockSpec((1, E_pad), lambda b: (0, 0)),
        ],
        # Rows [b*S, (b+1)*S) of the flat (B*S, E_pad) output -> already in
        # (B, S, E) order; the wrapper reshape below is free.
        out_specs=pl.BlockSpec((S, E_pad), lambda b: (b, 0)),
        compiler_params=pltpu.CompilerParams(
            # Batch axis is independent -> shard across v7x's two TensorCores.
            dimension_semantics=("parallel",),
        ),
    )(x4, weight, b2d)

    out = out_flat.reshape(B, S, E_pad)
    if E_pad != E:
        out = out[:, :, :E]
    return out


if __name__ == "__main__":
    # Small shapes consistent with the module: seq=8, batch=2, hidden=32, embed=64
    S, B, H, E = 8, 2, 32, 64

    key = jax.random.PRNGKey(0)
    k_x, k_w, k_b = jax.random.split(key, 3)

    hidden_states = jax.random.normal(k_x, (S, B, H), dtype=jnp.float32)
    # Deterministic parameter init (PyTorch Linear-like uniform bounds).
    bound = 1.0 / (H ** 0.5)
    weight = jax.random.uniform(k_w, (E, H), minval=-bound, maxval=bound,
                                dtype=jnp.float32)
    bias = jax.random.uniform(k_b, (E,), minval=-bound, maxval=bound,
                              dtype=jnp.float32)

    fn = jax.jit(swa_linear)
    out = fn(hidden_states, weight, bias)
    out = jax.block_until_ready(out)

    # Reference in plain JAX (same math as the PyTorch forward).
    ref = jnp.einsum("sbh,eh->bse", hidden_states, weight) + bias
    assert out.shape == (B, S, E)
    assert jnp.allclose(out, ref, atol=1e-4, rtol=1e-4), float(
        jnp.max(jnp.abs(out - ref)))

    print("KERNEL_OK")
</pallas_src>

<mosaic_0001>
module attributes {stable_mosaic.version = 11 : i64} {
  func.func @_linear_kernel(%arg0: i32, %arg1: memref<8x1x1x32xf32, #tpu.memory_space<vmem>>, %arg2: memref<128x32xf32, #tpu.memory_space<vmem>>, %arg3: memref<1x128xf32, #tpu.memory_space<vmem>>, %arg4: memref<8x128xf32, #tpu.memory_space<vmem>>) attributes {dimension_semantics = [#tpu.dimension_semantics<parallel>], iteration_bounds = array<i64: 2>, scalar_prefetch = 0 : i64, scratch_operands = 0 : i64, tpu.core_type = #tpu.core_type<tc>, window_params = [{transform_indices = @transform_0, window_bounds = array<i64: 8, 1, 1, 32>}, {pipeline_mode = #tpu.pipeline_mode<synchronous>, transform_indices = @transform_1, window_bounds = array<i64: 128, 32>}, {pipeline_mode = #tpu.pipeline_mode<synchronous>, transform_indices = @transform_2, window_bounds = array<i64: 1, 128>}, {transform_indices = @transform_3, window_bounds = array<i64: 8, 128>}]} {
    %c0 = arith.constant 0 : index
    %c0_0 = arith.constant 0 : index
    %c0_1 = arith.constant 0 : index
    %c0_2 = arith.constant 0 : index
    %0 = vector.load %arg1[%c0, %c0_0, %c0_1, %c0_2] : memref<8x1x1x32xf32, #tpu.memory_space<vmem>>, vector<8x1x1x32xf32>
    %1 = vector.shape_cast %0 : vector<8x1x1x32xf32> to vector<8x32xf32>
    %c0_3 = arith.constant 0 : index
    %c0_4 = arith.constant 0 : index
    %2 = vector.load %arg2[%c0_3, %c0_4] : memref<128x32xf32, #tpu.memory_space<vmem>>, vector<128x32xf32>
    %cst = arith.constant dense<0.000000e+00> : vector<8x128xf32>
    %3 = tpu.matmul %1, %2, %cst {dimension_numbers = #tpu.dot_dimension_numbers<[1], [1], [0], [0], [0, 0, 1, 0], [], []>} : vector<8x32xf32>, vector<128x32xf32>, vector<8x128xf32> -> vector<8x128xf32>
    %c0_5 = arith.constant 0 : index
    %c0_6 = arith.constant 0 : index
    %4 = vector.load %arg3[%c0_5, %c0_6] : memref<1x128xf32, #tpu.memory_space<vmem>>, vector<1x128xf32>
    %5 = vector.broadcast %4 : vector<1x128xf32> to vector<8x128xf32>
    %6 = arith.addf %3, %5 : vector<8x128xf32>
    %c0_7 = arith.constant 0 : index
    %c0_8 = arith.constant 0 : index
    %7 = vector.load %arg4[%c0_7, %c0_8] : memref<8x128xf32, #tpu.memory_space<vmem>>, vector<8x128xf32>
    tpu.vector_store %arg4[%c0_7, %c0_8], %6 {strides = array<i32>} : memref<8x128xf32, #tpu.memory_space<vmem>>, vector<8x128xf32>,
    return
  }
  func.func @transform_0(%arg0: i32) -> (i32, i32, i32, i32) {
    %c0_i32 = arith.constant 0 : i32
    %c0_i32_0 = arith.constant 0 : i32
    %c0_i32_1 = arith.constant 0 : i32
    %c0_i32_2 = arith.constant 0 : i32
    return %c0_i32, %arg0, %c0_i32_0, %c0_i32_1 : i32, i32, i32, i32
  }
  func.func @transform_1(%arg0: i32) -> (i32, i32) {
    %c0_i32 = arith.constant 0 : i32
    %c0_i32_0 = arith.constant 0 : i32
    %c0_i32_1 = arith.constant 0 : i32
    return %c0_i32, %c0_i32_0 : i32, i32
  }
  func.func @transform_2(%arg0: i32) -> (i32, i32) {
    %c0_i32 = arith.constant 0 : i32
    %c0_i32_0 = arith.constant 0 : i32
    %c0_i32_1 = arith.constant 0 : i32
    return %c0_i32, %c0_i32_0 : i32, i32
  }
  func.func @transform_3(%arg0: i32) -> (i32, i32) {
    %c0_i32 = arith.constant 0 : i32
    %c0_i32_0 = arith.constant 0 : i32
    return %arg0, %c0_i32 : i32, i32
  }
}

</mosaic_0001>

<bundles_post_ra>
// kernel: swa_linear.1
= control target key start
LH: loop header
LB: loop body
LE: loop exit
PB: predicated region body
PF: predicated region fallthrough
CT: control target
= control target key end

     0   :  { %8 = vsyncpa [#allocation4], 0  ;;  %s761_s0 = inlined_call_operand.vmem [shape: f32[8,2,1,32], index: 0, kind: input, shape index: {}]   ;;  %s762_s1 = inlined_call_operand.vmem [shape: f32[128,32], index: 1, kind: input, shape index: {}]   ;;  %s763_s2 = inlined_call_operand.vmem [shape: f32[1,128], index: 2, kind: input, shape index: {}]   ;;  %s764_s3 = inlined_call_operand.hbm [shape: f32[16,128], index: 3, kind: output, shape index: {}]  }
   0x1   :  { %10 = vsyncpa [#allocation4 + $0x1], 0  ;;  %s595_s12 = smov 0   ;;  %s597_s13 = smov 0  }
   0x2   :  { %s599_s14 = smov 0   ;;  %s601_s15 = smov 0  }
   0x3 LB: > { %s442_s16 = sadd.s32 4294967295, %s573_s15   ;;  %s443_s17 = sadd.s32 4294967294, %s573_s15   ;;  %s573_s15 = sphi %s601_s15, %s770_s15   ;;  %s569_s14 = sphi %s599_s14, %s769_s14   ;;  %s565_s13 = sphi %s597_s13, %s768_s13   ;;  %s561_s12 = sphi %s595_s12, %s767_s12  }
   0x4   : > { %s618_s18 = sadd.s32 1, %s573_s15   ;;  %s23_s19 = sadd.s32 1, %s569_s14 }
   0x5   : > { %s20_s20 = ssub.s32 %s573_s15, %s618_s18  ;;  %p30_p0 = scmp.ne.s32.totalorder %s569_s14, %s565_s13 }
   0x6   : > { %p21_p1 = scmp.eq.s32.totalorder %s20_s20, 0  ;;  %p31_p2 = scmp.eq.s32.totalorder %s573_s15, 0 }
   0x7   : > { %p102_p3 = scmp.eq.s32.totalorder %s442_s16, 1  ;;  %p107_p4 = scmp.ne.s32.totalorder %s565_s13, %s561_s12 }
   0x8   : > { %s631_s21 = scalar_select %p21_p1, %s569_s14, %s23_s19  }
   0x9   : > { %p32_p5 = por %p31_p2, %p30_p0  ;;  %p633_p6 = por %p102_p3, %p30_p0 }
   0xa   : > { %p108_p7 = scmp.eq.s32.totalorder %s443_s17, 1  ;;  %p445_p9 = scmp.ge.s32.totalorder %s573_s15, 2 }
   0xc   : > { %p637_p8 = por %p108_p7, %p107_p4  ;;  %130 = sbr.rel (%p445_p9) target bundleno = 29 (0x1d), region = 24 }
  0x11   : > { %133 = sbr.rel (!%p32_p5) target bundleno = 29 (0x1d), region = 28  ;;  %s135_s24 = sand.u32 (%p32_p5), 1, %s569_s14  }
  0x12   : > { %s138_s27 = scalar_lea.vmem (%p32_p5), %s761_s0, %s573_s15  ;;  %s446_s28 = sshll.u32 (%p32_p5), %s135_s24, 3 }
  0x13   : > { %v155_v0 = vld [vmem:[%s138_s27] sm:$0x1] (%p32_p5)  ;;  %v157_v1 = vld [vmem:[%s138_s27 + $0x2] sm:$0x1] (%p32_p5)  ;;  %v159_v2 = vld [vmem:[%s138_s27 + $0x4] sm:$0x1] (%p32_p5) }
  0x14   : > { %s137_s29 = scalar_lea.vmem (%p32_p5), [#allocation2], %s446_s28  ;;  %v161_v3 = vld [vmem:[%s138_s27 + $0x6] sm:$0x1] (%p32_p5)  ;;  %v163_v4 = vld [vmem:[%s138_s27 + $0x8] sm:$0x1] (%p32_p5) }
  0x15   : > { %156 = vst [vmem:[%s137_s29] sm:$0x1] (%p32_p5), %v155_v0  ;;  %v165_v5 = vld [vmem:[%s138_s27 + $0xa] sm:$0x1] (%p32_p5)  ;;  %v167_v6 = vld [vmem:[%s138_s27 + $0xc] sm:$0x1] (%p32_p5) }
  0x16   : > { %158 = vst [vmem:[%s137_s29 + $0x1] sm:$0x1] %v157_v1  ;;  %v169_v7 = vld [vmem:[%s138_s27 + $0xe] sm:$0x1] }
  0x17   : > { %160 = vst [vmem:[%s137_s29 + $0x2] sm:$0x1] %v159_v2 }
  0x18   : > { %162 = vst [vmem:[%s137_s29 + $0x3] sm:$0x1] %v161_v3 }
  0x19   : > { %164 = vst [vmem:[%s137_s29 + $0x4] sm:$0x1] %v163_v4 }
  0x1a   : > { %166 = vst [vmem:[%s137_s29 + $0x5] sm:$0x1] %v165_v5 }
  0x1b   : > { %168 = vst [vmem:[%s137_s29 + $0x6] sm:$0x1] %v167_v6 }
  0x1c   : > { %170 = vst [vmem:[%s137_s29 + $0x7] sm:$0x1] %v169_v7 }
  0x1d PF: > { %p447_p10 = scmp.ge.s32.totalorder %s573_s15, 1  ;;  %p209_p11 = scmp.lt.s32.totalorder %s573_s15, 3 }
  0x1f   : > { %p210_p12 = pnand %p447_p10, %p209_p11 }
  0x20   : > { %s216_s19 = sand.u32 (!%p210_p12), 1, %s565_s13   ;;  %s468_s4 = sshll.u32 (!%p210_p12), %s442_s16, 3 }
  0x21   : > { %213 = sbr.rel (%p210_p12) target bundleno = 233 (0xe9), region = 69  ;;  %s674_s20 = sshll.u32 (!%p210_p12), %s216_s19, 3 }
  0x22   : > { %s218_s28 = scalar_lea.vmem (!%p210_p12), [#allocation2], %s674_s20  ;;  %s374_s7 = scalar_lea.hbm (!%p210_p12), %s764_s3, %s468_s4 }
  0x23   : > { %s238_s10 = scalar_lea.vmem (!%p210_p12), [#allocation3], %s674_s20  ;;  %s378_s17 = sshll.u32 (!%p210_p12), %s374_s7, 4  ;;  %s379_s17 = int_to_ptr.hbm [resolvable:$true] %s378_s17 }
  0x24   : > { %s376_s11 = sshll.u32 (!%p210_p12), %s238_s10, 4  ;;  %s364_s24 = scalar_lea.sflag (!%p210_p12), [#allocation4], %s216_s19  ;;  %s377_s11 = int_to_ptr.vmem [resolvable:$true] %s376_s11 }
  0x25   : > { %s525_s16 = sshra.s32 (!%p210_p12), %s379_s17, 4  ;;  %s531_s20 = scalar_lea.hbm (!%p210_p12), %s764_s3, 16  ;;  %s526_s16 = int_to_ptr.hbm [resolvable:$true] %s525_s16 }
  0x26   : > { %v262_v8 = vld [vmem:[%s762_s1 + $0x78] sm:$0xff]  ;;  %vm291_vm0 = vcmask 261120   ;;  %v261_v9 = vld [vmem:[%s762_s1 + $0x70] sm:$0xff]  ;;  %v260_v10 = vld [vmem:[%s762_s1 + $0x68] sm:$0xff]  ;;  %s527_s25 = scalar_lea.hbm %s526_s16, 8  ;;  %p532_p2 = scmp.lt.s32.totalorder %s526_s16, %s764_s3 }
  0x27   : > { %450 = vmatpush.xpose.msk.msra.mxu0 %vm291_vm0, %v262_v8  ;;  %v259_v11 = vld [vmem:[%s762_s1 + $0x60] sm:$0xff]  ;;  %v258_v12 = vld [vmem:[%s762_s1 + $0x58] sm:$0xff]  ;;  %v257_v13 = vld [vmem:[%s762_s1 + $0x50] sm:$0xff]  ;;  %p528_p13 = scmp.ne.s32.totalorder %s526_s16, %s527_s25  ;;  %p533_p3 = scmp.lt.s32.totalorder %s531_s20, %s527_s25 }
  0x28   : > { %v256_v14 = vld [vmem:[%s762_s1 + $0x48] sm:$0xff]  ;;  %v255_v18 = vld [vmem:[%s762_s1 + $0x40] sm:$0xff]  ;;  %v254_v23 = vld [vmem:[%s762_s1 + $0x38] sm:$0xff] }
  0x29   : > { %v239_v15 = vld [vmem:[%s218_s28] sm:$0x1]  ;;  %v240_v16 = vld [vmem:[%s218_s28 + $0x1] sm:$0x1]  ;;  %v241_v17 = vld [vmem:[%s218_s28 + $0x2] sm:$0x1]  ;;  %p529_p0 = pnand %p528_p13, %p633_p6  ;;  %p534_p4 = por %p533_p3, %p532_p2 }
  0x2a   : > { %v242_v19 = vld [vmem:[%s218_s28 + $0x3] sm:$0x1]  ;;  %275 = vst [vmem:[#allocation1] ss:$9 sm:$0xff] %v239_v15  ;;  %v243_v20 = vld [vmem:[%s218_s28 + $0x4] sm:$0x1] }
  0x2b   : > { %451 = vmatpush.xpose.msk.msra.mxu0 %vm291_vm0, %v261_v9  ;;  %277 = vst [vmem:[#allocation1 + $0x1] ss:$9 sm:$0xff] %v240_v16  ;;  %v244_v21 = vld [vmem:[%s218_s28 + $0x5] sm:$0x1]  ;;  %v245_v22 = vld [vmem:[%s218_s28 + $0x6] sm:$0x1]  ;;  %p530_p1 = pneg %p529_p0 }
  0x2c   : > { %279 = vst [vmem:[#allocation1 + $0x2] ss:$9 sm:$0xff] %v241_v17  ;;  %v246_v24 = vld [vmem:[%s218_s28 + $0x7] sm:$0x1]  ;;  %v251_v27 = vld [vmem:[%s762_s1 + $0x20] sm:$0xff]  ;;  %v250_v28 = vld [vmem:[%s762_s1 + $0x18] sm:$0xff] }
  0x2d   : > { %281 = vst [vmem:[#allocation1 + $0x3] ss:$9 sm:$0xff] %v242_v19  ;;  %v253_v25 = vld [vmem:[%s762_s1 + $0x30] sm:$0xff]  ;;  %v252_v26 = vld [vmem:[%s762_s1 + $0x28] sm:$0xff]  ;;  %v247_v31 = vld [vmem:[%s762_s1] sm:$0xff]  ;;  %p535_p5 = pnand %p534_p4, %p530_p1 }
  0x2e   : > { %283 = vst [vmem:[#allocation1 + $0x4] ss:$9 sm:$0xff] %v243_v20  ;;  %v249_v29 = vld [vmem:[%s762_s1 + $0x10] sm:$0xff]  ;;  %v248_v30 = vld [vmem:[%s762_s1 + $0x8] sm:$0xff]  ;;  %v510_v33 = vld [vmem:[%s763_s2] ss:$0 sm:$0xff] }
  0x2f   : > { %452 = vmatpush.xpose.msk.msra.mxu0 %vm291_vm0, %v260_v10  ;;  %285 = vst [vmem:[#allocation1 + $0x5] ss:$9 sm:$0xff] %v244_v21 }
  0x30   : > { %287 = vst [vmem:[#allocation1 + $0x6] ss:$9 sm:$0xff] %v245_v22 }
  0x31   : > { %289 = vst [vmem:[#allocation1 + $0x7] ss:$9 sm:$0xff] %v246_v24 }
  0x33   : > { %453 = vmatpush.xpose.msk.msra.mxu0 %vm291_vm0, %v259_v11 }
  0x37   : > { %454 = vmatpush.xpose.msk.msra.mxu0 %vm291_vm0, %v258_v12 }
  0x38   : > { %v290_v32 = vld [vmem:[#allocation1] sm:$0xff] }
  0x3b   : > { %455 = vmatpush.xpose.msk.msra.mxu0 %vm291_vm0, %v257_v13 }
  0x3f   : > { %456 = vmatpush.xpose.msk.msra.mxu0 %vm291_vm0, %v256_v14 }
  0x43   : > { %457 = vmatpush.xpose.msk.msra.mxu0 %vm291_vm0, %v255_v18 }
  0x47   : > { %458 = vmatpush.xpose.msk.msra.mxu0 %vm291_vm0, %v254_v23 }
  0x4b   : > { %459 = vmatpush.xpose.msk.msra.mxu0 %vm291_vm0, %v253_v25 }
  0x4f   : > { %460 = vmatpush.xpose.msk.msra.mxu0 %vm291_vm0, %v252_v26 }
  0x53   : > { %461 = vmatpush.xpose.msk.msra.mxu0 %vm291_vm0, %v251_v27 }
  0x57   : > { %462 = vmatpush.xpose.msk.msra.mxu0 %vm291_vm0, %v250_v28 }
  0x5b   : > { %463 = vmatpush.xpose.msk.msra.mxu0 %vm291_vm0, %v249_v29 }
  0x5f   : > { %464 = vmatpush.xpose.msk.msra.mxu0 %vm291_vm0, %v248_v30 }
  0x63   : > { %465 = vmatpush.xpose.msk.msra.mxu0 %vm291_vm0, %v247_v31 }
  0x66   : > { %466 = vmatmul.msk.f32.vlgmr.msra.gmra.mxu0 %vm291_vm0, %v290_v32 }
  0xe3   : > { %v359_v34 = vpop.f32.mrf.mxu0 }
  0xe4   : > { %v360_v35 = vadd.f32 %v510_v33, %v359_v34 }
  0xe6   : > { %362 = vst [vmem:[%s238_s10] sm:$0xff] %v360_v35 }
  0xe7   : > { %538 = shalt.err (!%p535_p5)
}
  0xe8   : > { %471 = dma.vmem_to_hbm [thread:$0]  (%p633_p6), %s377_s11, 128, %s379_s17, %s364_s24  }
  0xe9 PF: > { %s390_s19 = sand.u32 1, %s561_s12   ;;  %p474_p7 = pnand %p445_p9, %p637_p8 }
  0xea   : > { %s391_s30 = scalar_lea.sflag [#allocation4], %s390_s19 }
  0xeb   : > { %p475_p10 = pneg %p474_p7 }
  0xed   : > { %556 = dma.done.wait (%p475_p10), %s391_s30, 128  }
  0xee   : > { %558 = vsyncadd (%p475_p10), %s391_s30, 4294967168  ;;  %p13_p11 = scmp.ge.s32.totalorder %s618_s18, 4   ;;  %s767_s12 = smov %s565_s13 }
  0xef   : > { %s768_s13 = smov %s569_s14  ;;  %s769_s14 = smov %s631_s21 }
  0xf0   : > { %s770_s15 = smov %s618_s18  ;;  %15 = sbr.rel (!%p13_p11) target bundleno = 3 (0x3), region = 120 }
  0xf5   :  { %397 = vsyncpa [#allocation4], 1 }
  0xf6   :  { %399 = vsyncpa [#allocation4 + $0x1], 1 }

</bundles_post_ra>
